<compile_context>
chip_gen: v6e
topology: v6e:2x2x1
jax: 0.10.0
libtpu: 0.0.40
codegen_flags: <defaults>
</compile_context>

<pallas_src>
import jax
import jax.numpy as jnp
from jax.experimental import pallas as pl
from jax.experimental.pallas import tpu as pltpu


def _round_up(x, m):
    return (x + m - 1) // m * m


def _vmem_capacity_bytes():
    """Physical VMEM per TensorCore; conservative (v7x) fallback if unknown."""
    try:
        info = pltpu.get_tpu_info()
        cap = getattr(info, "vmem_capacity_bytes", None)
        if cap:
            return int(cap)
    except Exception:
        pass
    return 64 * 1024 * 1024


def _head_kernel(x_ref, wt_ref, b_ref, o_ref):
    # x_ref: (tm, nf), wt_ref: (nf, action_dim), b_ref: (1, action_dim)
    acc = jnp.dot(x_ref[...], wt_ref[...], preferred_element_type=jnp.float32)
    acc = acc + b_ref[...].astype(jnp.float32)
    # Dropout(head_dropout) is identity in eval/inference mode.
    o_ref[...] = acc.astype(o_ref.dtype)


def flatten_head_forward(x, weight, bias):
    """FlattenHead forward pass (eval mode).

    x:      (..., D, P)       -> flattened to (..., nf), nf = D * P
    weight: (action_dim, nf)  nn.Linear weight, PyTorch (out, in) layout
    bias:   (action_dim,)
    returns (..., action_dim)
    """
    *lead, D, P = x.shape
    nf = D * P
    action_dim = weight.shape[0]
    assert weight.shape == (action_dim, nf)
    assert bias.shape == (action_dim,)

    # Flatten(start_dim=-2) + merge leading dims (row-major == torch .flatten).
    x2d = x.reshape((-1, nf))                      # (M, nf)
    M = x2d.shape[0]
    x_item = jnp.dtype(x2d.dtype).itemsize
    w_item = jnp.dtype(weight.dtype).itemsize

    # Minimum sublane multiple is dtype-dependent (sub-32-bit packs sublanes).
    min_sublane = {4: 8, 2: 16, 1: 32}.get(x_item, 8)

    # --- Generation-aware VMEM budget -------------------------------------
    vmem_cap = _vmem_capacity_bytes()
    if vmem_cap >= 128 * 1024 * 1024:          # v5e / v6e: 128 MiB physical VMEM
        x_tile_budget = 14 * 1024 * 1024
        vmem_limit = 64 * 1024 * 1024
    else:                                      # v7x: 64 MiB per TensorCore
        x_tile_budget = 8 * 1024 * 1024
        vmem_limit = 44 * 1024 * 1024

    # Budget arithmetic: 2x x tile + 2x out tile + weight + bias. Weight/bias
    # are counted double-buffered so the non-Buffered(1) fallback also fits.
    reserve = 2 * 1024 * 1024
    fixed = 2 * (nf * action_dim + action_dim) * w_item
    per_row = 2 * (nf + action_dim) * x_item
    usable = max(vmem_limit - reserve - fixed, per_row * min_sublane)

    tm_budget = min(x_tile_budget // max(nf * x_item, 1), usable // per_row)
    tm_budget = max(min_sublane, (tm_budget // min_sublane) * min_sublane)

    # Keep at least two grid steps when M allows it so v7x's second TensorCore
    # gets work; rounded UP so two steps still cover all of M.
    tm_split = _round_up(pl.cdiv(M, 2), min_sublane)

    tm = int(max(min_sublane, min(tm_budget, tm_split)))
    grid_m = pl.cdiv(M, tm)                    # ragged last block handled by Pallas

    # One-time tiny transpose to MXU-natural (K, N) layout; negligible HBM
    # traffic compared to streaming x.
    w_t = weight.T                             # (nf, action_dim)
    b2d = bias.reshape((1, action_dim))

    def call(single_buffer_resident):
        if single_buffer_resident:
            w_spec = pl.BlockSpec((nf, action_dim), lambda i: (0, 0),
                                  pipeline_mode=pl.Buffered(1))
            b_spec = pl.BlockSpec((1, action_dim), lambda i: (0, 0),
                                  pipeline_mode=pl.Buffered(1))
        else:
            w_spec = pl.BlockSpec((nf, action_dim), lambda i: (0, 0))
            b_spec = pl.BlockSpec((1, action_dim), lambda i: (0, 0))
        return pl.pallas_call(
            _head_kernel,
            out_shape=jax.ShapeDtypeStruct((M, action_dim), x.dtype),
            grid_spec=pltpu.PrefetchScalarGridSpec(
                num_scalar_prefetch=0,
                grid=(grid_m,),
                in_specs=[
                    pl.BlockSpec((tm, nf), lambda i: (i, 0)),        # x tile (pipelined)
                    w_spec,                                          # resident weight
                    b_spec,                                          # resident bias
                ],
                out_specs=pl.BlockSpec((tm, action_dim), lambda i: (i, 0)),
            ),
            compiler_params=pltpu.CompilerParams(
                # M axis is embarrassingly parallel -> megacore sharding on v7x.
                dimension_semantics=("parallel",),
                vmem_limit_bytes=vmem_limit,
            ),
        )(x2d, w_t, b2d)

    try:
        out = call(True)
    except Exception:
        # Some jax versions reject Buffered(1) on inputs; resident blocks are
        # small and already budgeted double-buffered, so fall back cleanly.
        # (Only effective for eager calls; under jit the default path is used.)
        out = call(False)

    return out.reshape((*lead, action_dim))


if __name__ == "__main__":
    # Small shapes consistent with the module: (B, n_vars, d_model, patch_num).
    # M = B * n_vars = 15 is deliberately not a multiple of the tile to
    # exercise the ragged-last-block (cdiv grid, no wrapper padding) path.
    B, n_vars, D, P = 3, 5, 16, 8
    nf = D * P                 # Linear in_features = 128
    action_dim = 16
    head_dropout = 0.1         # identity in eval mode

    key = jax.random.PRNGKey(0)
    kx, kw, kb = jax.random.split(key, 3)

    x = jax.random.normal(kx, (B, n_vars, D, P), dtype=jnp.float32)
    # nn.Linear parameter shapes: W (out, in), b (out,)
    weight = jax.random.normal(kw, (action_dim, nf), dtype=jnp.float32) * 0.05
    bias = jax.random.normal(kb, (action_dim,), dtype=jnp.float32) * 0.05

    y = flatten_head_forward(x, weight, bias)
    jax.block_until_ready(y)

    # Reference: flatten -> linear -> identity dropout, in plain JAX.
    ref = x.reshape(B, n_vars, nf) @ weight.T + bias
    assert y.shape == (B, n_vars, action_dim)
    assert jnp.allclose(y, ref, atol=1e-5, rtol=1e-5)

    # TODO(synk): optional bf16 input/weight casting (≈2x throughput on this
    # HBM-bound kernel) left to the caller to preserve f32 parity with PyTorch.
    print("KERNEL_OK")
</pallas_src>

<mosaic_0001>
module attributes {stable_mosaic.version = 11 : i64} {
  func.func @_head_kernel(%arg0: i32, %arg1: memref<8x128xf32, #tpu.memory_space<vmem>>, %arg2: memref<128x16xf32, #tpu.memory_space<vmem>>, %arg3: memref<1x16xf32, #tpu.memory_space<vmem>>, %arg4: memref<8x16xf32, #tpu.memory_space<vmem>>) attributes {dimension_semantics = [#tpu.dimension_semantics<parallel>], iteration_bounds = array<i64: 2>, scalar_prefetch = 0 : i64, scratch_operands = 0 : i64, tpu.core_type = #tpu.core_type<tc>, window_params = [{transform_indices = @transform_0, window_bounds = array<i64: 8, 128>}, {pipeline_mode = #tpu.pipeline_mode<synchronous>, transform_indices = @transform_1, window_bounds = array<i64: 128, 16>}, {pipeline_mode = #tpu.pipeline_mode<synchronous>, transform_indices = @transform_2, window_bounds = array<i64: 1, 16>}, {transform_indices = @transform_3, window_bounds = array<i64: 8, 16>}]} {
    %c0 = arith.constant 0 : index
    %c0_0 = arith.constant 0 : index
    %0 = vector.load %arg1[%c0, %c0_0] : memref<8x128xf32, #tpu.memory_space<vmem>>, vector<8x128xf32>
    %c0_1 = arith.constant 0 : index
    %c0_2 = arith.constant 0 : index
    %1 = vector.load %arg2[%c0_1, %c0_2] : memref<128x16xf32, #tpu.memory_space<vmem>>, vector<128x16xf32>
    %cst = arith.constant dense<0.000000e+00> : vector<8x16xf32>
    %2 = tpu.matmul %0, %1, %cst {dimension_numbers = #tpu.dot_dimension_numbers<[1], [0], [0], [1], [0, 0, 1, 1], [], []>} : vector<8x128xf32>, vector<128x16xf32>, vector<8x16xf32> -> vector<8x16xf32>
    %c0_3 = arith.constant 0 : index
    %c0_4 = arith.constant 0 : index
    %3 = vector.load %arg3[%c0_3, %c0_4] : memref<1x16xf32, #tpu.memory_space<vmem>>, vector<1x16xf32>
    %4 = vector.broadcast %3 : vector<1x16xf32> to vector<8x16xf32>
    %5 = arith.addf %2, %4 : vector<8x16xf32>
    %c0_5 = arith.constant 0 : index
    %c0_6 = arith.constant 0 : index
    %6 = vector.load %arg4[%c0_5, %c0_6] : memref<8x16xf32, #tpu.memory_space<vmem>>, vector<8x16xf32>
    tpu.vector_store %arg4[%c0_5, %c0_6], %5 {strides = array<i32>} : memref<8x16xf32, #tpu.memory_space<vmem>>, vector<8x16xf32>,
    return
  }
  func.func @transform_0(%arg0: i32) -> (i32, i32) {
    %c0_i32 = arith.constant 0 : i32
    %c0_i32_0 = arith.constant 0 : i32
    return %arg0, %c0_i32 : i32, i32
  }
  func.func @transform_1(%arg0: i32) -> (i32, i32) {
    %c0_i32 = arith.constant 0 : i32
    %c0_i32_0 = arith.constant 0 : i32
    %c0_i32_1 = arith.constant 0 : i32
    return %c0_i32, %c0_i32_0 : i32, i32
  }
  func.func @transform_2(%arg0: i32) -> (i32, i32) {
    %c0_i32 = arith.constant 0 : i32
    %c0_i32_0 = arith.constant 0 : i32
    %c0_i32_1 = arith.constant 0 : i32
    return %c0_i32, %c0_i32_0 : i32, i32
  }
  func.func @transform_3(%arg0: i32) -> (i32, i32) {
    %c0_i32 = arith.constant 0 : i32
    %c0_i32_0 = arith.constant 0 : i32
    return %arg0, %c0_i32 : i32, i32
  }
}

module attributes {stable_mosaic.version = 11 : i64} {
  func.func @_head_kernel(%arg0: i32, %arg1: memref<8x128xf32, #tpu.memory_space<vmem>>, %arg2: memref<128x16xf32, #tpu.memory_space<vmem>>, %arg3: memref<1x16xf32, #tpu.memory_space<vmem>>, %arg4: memref<8x16xf32, #tpu.memory_space<vmem>>) attributes {dimension_semantics = [#tpu.dimension_semantics<parallel>], iteration_bounds = array<i64: 2>, scalar_prefetch = 0 : i64, scratch_operands = 0 : i64, tpu.core_type = #tpu.core_type<tc>, window_params = [{transform_indices = @transform_0, window_bounds = array<i64: 8, 128>}, {pipeline_mode = #tpu.pipeline_mode<synchronous>, transform_indices = @transform_1, window_bounds = array<i64: 128, 16>}, {pipeline_mode = #tpu.pipeline_mode<synchronous>, transform_indices = @transform_2, window_bounds = array<i64: 1, 16>}, {transform_indices = @transform_3, window_bounds = array<i64: 8, 16>}]} {
    %c0 = arith.constant 0 : index
    %c0_0 = arith.constant 0 : index
    %0 = vector.load %arg1[%c0, %c0_0] : memref<8x128xf32, #tpu.memory_space<vmem>>, vector<8x128xf32>
    %c0_1 = arith.constant 0 : index
    %c0_2 = arith.constant 0 : index
    %1 = vector.load %arg2[%c0_1, %c0_2] : memref<128x16xf32, #tpu.memory_space<vmem>>, vector<128x16xf32>
    %cst = arith.constant dense<0.000000e+00> : vector<8x16xf32>
    %2 = tpu.matmul %0, %1, %cst {dimension_numbers = #tpu.dot_dimension_numbers<[1], [0], [0], [1], [0, 0, 1, 1], [], []>} : vector<8x128xf32>, vector<128x16xf32>, vector<8x16xf32> -> vector<8x16xf32>
    %c0_3 = arith.constant 0 : index
    %c0_4 = arith.constant 0 : index
    %3 = vector.load %arg3[%c0_3, %c0_4] : memref<1x16xf32, #tpu.memory_space<vmem>>, vector<1x16xf32>
    %4 = vector.broadcast %3 : vector<1x16xf32> to vector<8x16xf32>
    %5 = arith.addf %2, %4 : vector<8x16xf32>
    %c0_5 = arith.constant 0 : index
    %c0_6 = arith.constant 0 : index
    %6 = vector.load %arg4[%c0_5, %c0_6] : memref<8x16xf32, #tpu.memory_space<vmem>>, vector<8x16xf32>
    tpu.vector_store %arg4[%c0_5, %c0_6], %5 {strides = array<i32>} : memref<8x16xf32, #tpu.memory_space<vmem>>, vector<8x16xf32>,
    return
  }
  func.func @transform_0(%arg0: i32) -> (i32, i32) {
    %c0_i32 = arith.constant 0 : i32
    %c0_i32_0 = arith.constant 0 : i32
    return %arg0, %c0_i32 : i32, i32
  }
  func.func @transform_1(%arg0: i32) -> (i32, i32) {
    %c0_i32 = arith.constant 0 : i32
    %c0_i32_0 = arith.constant 0 : i32
    %c0_i32_1 = arith.constant 0 : i32
    return %c0_i32, %c0_i32_0 : i32, i32
  }
  func.func @transform_2(%arg0: i32) -> (i32, i32) {
    %c0_i32 = arith.constant 0 : i32
    %c0_i32_0 = arith.constant 0 : i32
    %c0_i32_1 = arith.constant 0 : i32
    return %c0_i32, %c0_i32_0 : i32, i32
  }
  func.func @transform_3(%arg0: i32) -> (i32, i32) {
    %c0_i32 = arith.constant 0 : i32
    %c0_i32_0 = arith.constant 0 : i32
    return %arg0, %c0_i32 : i32, i32
  }
}

</mosaic_0001>

<bundles_post_ra>
// kernel: tpu_custom_call.1
= control target key start
LH: loop header
LB: loop body
LE: loop exit
PB: predicated region body
PF: predicated region fallthrough
CT: control target
= control target key end

     0   :  { %8 = vsyncpa [#allocation3], 0  ;;  %s668_s0 = inlined_call_operand.vmem [shape: f32[15,128], index: 0, kind: input, shape index: {}]   ;;  %s669_s1 = inlined_call_operand.vmem [shape: f32[128,16], index: 1, kind: input, shape index: {}]   ;;  %s670_s2 = inlined_call_operand.vmem [shape: f32[1,16], index: 2, kind: input, shape index: {}]   ;;  %s671_s3 = inlined_call_operand.hbm [shape: f32[15,16], index: 3, kind: output, shape index: {}]  }
   0x1   :  { %10 = vsyncpa [#allocation3 + $0x1], 0  ;;  %s524_s12 = smov 0   ;;  %s526_s13 = smov 0  }
   0x2   :  { %s528_s14 = smov 0   ;;  %s530_s15 = smov 0  }
   0x3 LB: > { %s545_s16 = sadd.s32 4294967295, %s499_s15   ;;  %s335_s17 = sadd.s32 4294967294, %s499_s15   ;;  %s499_s15 = sphi %s530_s15, %s677_s15   ;;  %s495_s14 = sphi %s528_s14, %s676_s14   ;;  %s491_s13 = sphi %s526_s13, %s675_s13   ;;  %s487_s12 = sphi %s524_s12, %s674_s12  }
   0x4   : > { %s549_s18 = sadd.s32 1, %s499_s15   ;;  %s91_s19 = sadd.s32 1, %s495_s14 }
   0x5   : > { %s88_s20 = ssub.s32 %s499_s15, %s549_s18  ;;  %p101_p0 = scmp.ne.s32.totalorder %s495_s14, %s491_s13 }
   0x6   : > { %p89_p1 = scmp.eq.s32.totalorder %s88_s20, 0  ;;  %p102_p2 = scmp.eq.s32.totalorder %s545_s16, 1 }
   0x7   : > { %p107_p3 = scmp.ne.s32.totalorder %s491_s13, %s487_s12  ;;  %p108_p4 = scmp.eq.s32.totalorder %s335_s17, 1 }
   0x8   : > { %s560_s21 = scalar_select %p89_p1, %s495_s14, %s91_s19  }
   0x9   : > { %p562_p5 = por %p102_p2, %p101_p0  ;;  %p566_p6 = por %p108_p4, %p107_p3 }
   0xa   : > { %p338_p7 = scmp.ge.s32.totalorder %s499_s15, 1  ;;  %p139_p8 = scmp.lt.s32.totalorder %s499_s15, 3 }
   0xc   : > { %p140_p9 = pnand %p338_p7, %p139_p8 }
   0xd   : > { %p162_p10 = scmp.lt.s32.totalorder (!%p140_p9), %s545_s16, 1  ;;  %s159_s25 = sand.u32 (!%p140_p9), 1, %s491_s13  }
   0xe   : > { %143 = sbr.rel (%p140_p9) target bundleno = 260 (0x104), region = 32  ;;  %s339_s26 = sshll.u32 (!%p140_p9), %s159_s25, 3 }
   0xf   : > { %s343_s29 = sshll.u32 (!%p140_p9), %s545_s16, 7  ;;  %s161_s30 = scalar_lea.vmem (!%p140_p9), [#allocation2], %s339_s26 }
  0x10   : > { %s276_s4 = sshll.u32 (!%p140_p9), %s161_s30, 4  ;;  %s633_s7 = scalar_lea.hbm (!%p140_p9), %s671_s3, %s343_s29  ;;  %s277_s4 = int_to_ptr.vmem [resolvable:$true] %s276_s4 }
  0x11   : > { %s263_s8 = scalar_lea.sflag (!%p140_p9), [#allocation3], %s159_s25  ;;  %s439_s9 = scalar_lea.vmem (!%p140_p9), %s277_s4, 128 }
  0x12   : > { %p440_p11 = scmp.ne.s32.totalorder (!%p140_p9), %s277_s4, %s439_s9 }
  0x13   : > { %v182_v0 = vld [vmem:[%s669_s1 + $0x78] sm:$0xff]  ;;  %v501_v1 = vmov 0.0   ;;  %v181_v2 = vld [vmem:[%s669_s1 + $0x70] sm:$0xff]  ;;  %vm502_vm0 = vmmov 0   ;;  %v180_v3 = vld [vmem:[%s669_s1 + $0x68] sm:$0xff]  ;;  %s163_s28 = scalar_select %p162_p10, %s545_s16, 1 }
  0x14   : > { %363 = vmatprep.subr.mxu0 %v501_v1  ;;  %395 = vmatprep.mubr.msk.f32.mxu0 %vm502_vm0, %v501_v1  ;;  %v179_v4 = vld [vmem:[%s669_s1 + $0x60] sm:$0xff]  ;;  %v178_v5 = vld [vmem:[%s669_s1 + $0x58] sm:$0xff]  ;;  %v177_v6 = vld [vmem:[%s669_s1 + $0x50] sm:$0xff]  ;;  %vm260_vm1 = vcmask 130048   ;;  %p441_p12 = pnand %p440_p11, %p562_p5  ;;  %s503_s16 = smov [#allocation2]  }
  0x15   : > { %364 = vmatpush3.msra.mxu0 %v182_v0  ;;  %v176_v7 = vld [vmem:[%s669_s1 + $0x48] sm:$0xff]  ;;  %v175_v8 = vld [vmem:[%s669_s1 + $0x40] sm:$0xff]  ;;  %v174_v9 = vld [vmem:[%s669_s1 + $0x38] sm:$0xff]  ;;  %s340_s6 = sshll.u32 %s163_s28, 3  ;;  %s443_s10 = sshll.u32 %s503_s16, 4  ;;  %s444_s10 = int_to_ptr.vmem [resolvable:$false] %s443_s10 }
  0x16   : > { %365 = vmatprep.subr.mxu0 %v501_v1  ;;  %v173_v10 = vld [vmem:[%s669_s1 + $0x30] sm:$0xff]  ;;  %v172_v11 = vld [vmem:[%s669_s1 + $0x28] sm:$0xff]  ;;  %v171_v12 = vld [vmem:[%s669_s1 + $0x20] sm:$0xff]  ;;  %s165_s19 = scalar_lea.vmem %s668_s0, %s340_s6  ;;  %p442_p13 = pneg %p441_p12 }
  0x17   : > { %366 = vmatpush3.msra.mxu0 %v181_v2  ;;  %v170_v13 = vld [vmem:[%s669_s1 + $0x18] sm:$0xff]  ;;  %v169_v14 = vld [vmem:[%s669_s1 + $0x10] sm:$0xff]  ;;  %v168_v15 = vld [vmem:[%s669_s1 + $0x8] sm:$0xff]  ;;  %s445_s11 = scalar_lea.vmem %s444_s10, 256  ;;  %p446_p0 = scmp.lt.s32.totalorder %s277_s4, %s444_s10 }
  0x18   : > { %367 = vmatprep.subr.mxu0 %v501_v1  ;;  %v167_v16 = vld [vmem:[%s669_s1] sm:$0xff]  ;;  %p447_p1 = scmp.lt.s32.totalorder %s445_s11, %s439_s9 }
  0x19   : > { %368 = vmatpush3.msra.mxu0 %v180_v3  ;;  %v166_v17 = vld [vmem:[%s165_s19] sm:$0xff] }
  0x1a   : > { %369 = vmatprep.subr.mxu0 %v501_v1  ;;  %v341_v18 = vld [vmem:[%s670_s2] ss:$0 sm:$0xff]  ;;  %p448_p2 = por %p447_p1, %p446_p0 }
  0x1b   : > { %370 = vmatpush3.msra.mxu0 %v179_v4 }
  0x1c   : > { %371 = vmatprep.subr.mxu0 %v501_v1  ;;  %p449_p3 = pnand %p448_p2, %p442_p13 }
  0x1d   : > { %372 = vmatpush3.msra.mxu0 %v178_v5 }
  0x1e   : > { %373 = vmatprep.subr.mxu0 %v501_v1 }
  0x1f   : > { %374 = vmatpush3.msra.mxu0 %v177_v6 }
  0x20   : > { %375 = vmatprep.subr.mxu0 %v501_v1 }
  0x21   : > { %376 = vmatpush3.msra.mxu0 %v176_v7 }
  0x22   : > { %377 = vmatprep.subr.mxu0 %v501_v1 }
  0x23   : > { %378 = vmatpush3.msra.mxu0 %v175_v8 }
  0x24   : > { %379 = vmatprep.subr.mxu0 %v501_v1 }
  0x25   : > { %380 = vmatpush3.msra.mxu0 %v174_v9 }
  0x26   : > { %381 = vmatprep.subr.mxu0 %v501_v1 }
  0x27   : > { %382 = vmatpush3.msra.mxu0 %v173_v10 }
  0x28   : > { %383 = vmatprep.subr.mxu0 %v501_v1 }
  0x29   : > { %384 = vmatpush3.msra.mxu0 %v172_v11 }
  0x2a   : > { %385 = vmatprep.subr.mxu0 %v501_v1 }
  0x2b   : > { %386 = vmatpush3.msra.mxu0 %v171_v12 }
  0x2c   : > { %387 = vmatprep.subr.mxu0 %v501_v1 }
  0x2d   : > { %388 = vmatpush3.msra.mxu0 %v170_v13 }
  0x2e   : > { %389 = vmatprep.subr.mxu0 %v501_v1 }
  0x2f   : > { %390 = vmatpush3.msra.mxu0 %v169_v14 }
  0x30   : > { %391 = vmatprep.subr.mxu0 %v501_v1 }
  0x31   : > { %392 = vmatpush3.msra.mxu0 %v168_v15 }
  0x32   : > { %393 = vmatprep.subr.mxu0 %v501_v1 }
  0x33   : > { %394 = vmatpush3.msra.mxu0 %v167_v16 }
  0x34   : > { %396 = vmatmul.mubr.f32.vlgmr.msra.gmra.mxu0 %v166_v17 }
  0xf4   : > { %v256_v19 = vpop.f32.mrf.mxu0 }
  0xf5   : > { %v257_v20 = vadd.f32 %v341_v18, %v256_v19 }
  0xf6   : > { %v397_v21 = vpop.f32.mrf.mxu0 }
  0xf7   : > { %261 = vst.msk [vmem:[%s161_s30] sm:$0xff] %vm260_vm1, %v257_v20 }
  0xf8   : > { %452 = shalt.err (!%p449_p3)
}
  0xf9   : > { %s453_s17 = scalar_lea.hbm %s633_s7, 128  ;;  %s457_s24 = scalar_lea.hbm %s671_s3, 256 }
  0xfa   : > { %p454_p4 = scmp.ne.s32.totalorder %s633_s7, %s453_s17  ;;  %p458_p9 = scmp.lt.s32.totalorder %s633_s7, %s671_s3 }
  0xfb   : > { %p459_p10 = scmp.lt.s32.totalorder %s457_s24, %s453_s17 }
  0xfc   : > { %p455_p7 = pnand %p454_p4, %p562_p5 }
  0xfd   : > { %p460_p11 = por %p459_p10, %p458_p9 }
  0xfe   : > { %p456_p8 = pneg %p455_p7 }
 0x100   : > { %p461_p12 = pnand %p460_p11, %p456_p8 }
 0x102   : > { %464 = shalt.err (!%p461_p12)
}
 0x103   : > { %398 = dma.vmem_to_hbm [thread:$0]  (%p562_p5), %s277_s4, 128, %s633_s7, %s263_s8  }
 0x104 PF: > { %p404_p13 = scmp.ge.s32.totalorder %s499_s15, 2  ;;  %s288_s27 = sand.u32 1, %s487_s12  }
 0x105   : > { %s289_s28 = scalar_lea.sflag [#allocation3], %s288_s27 }
 0x106   : > { %p401_p0 = pnand %p404_p13, %p566_p6 }
 0x108   : > { %p402_p1 = pneg %p401_p0 }
 0x10a   : > { %482 = dma.done.wait (%p402_p1), %s289_s28, 128  }
 0x10b   : > { %484 = vsyncadd (%p402_p1), %s289_s28, 4294967168  ;;  %p13_p2 = scmp.ge.s32.totalorder %s549_s18, 4   ;;  %s674_s12 = smov %s491_s13 }
 0x10c   : > { %s675_s13 = smov %s495_s14  ;;  %s676_s14 = smov %s560_s21 }
 0x10d   : > { %s677_s15 = smov %s549_s18  ;;  %15 = sbr.rel (!%p13_p2) target bundleno = 3 (0x3), region = 67 }
 0x112   :  { %294 = vsyncpa [#allocation3], 1 }
 0x113   :  { %296 = vsyncpa [#allocation3 + $0x1], 1 }

// kernel: tpu_custom_call.1
= control target key start
LH: loop header
LB: loop body
LE: loop exit
PB: predicated region body
PF: predicated region fallthrough
CT: control target
= control target key end

     0   :  { %8 = vsyncpa [#allocation3], 0  ;;  %s668_s0 = inlined_call_operand.vmem [shape: f32[15,128], index: 0, kind: input, shape index: {}]   ;;  %s669_s1 = inlined_call_operand.vmem [shape: f32[128,16], index: 1, kind: input, shape index: {}]   ;;  %s670_s2 = inlined_call_operand.vmem [shape: f32[1,16], index: 2, kind: input, shape index: {}]   ;;  %s671_s3 = inlined_call_operand.hbm [shape: f32[15,16], index: 3, kind: output, shape index: {}]  }
   0x1   :  { %10 = vsyncpa [#allocation3 + $0x1], 0  ;;  %s524_s12 = smov 0   ;;  %s526_s13 = smov 0  }
   0x2   :  { %s528_s14 = smov 0   ;;  %s530_s15 = smov 0  }
   0x3 LB: > { %s545_s16 = sadd.s32 4294967295, %s499_s15   ;;  %s335_s17 = sadd.s32 4294967294, %s499_s15   ;;  %s499_s15 = sphi %s530_s15, %s677_s15   ;;  %s495_s14 = sphi %s528_s14, %s676_s14   ;;  %s491_s13 = sphi %s526_s13, %s675_s13   ;;  %s487_s12 = sphi %s524_s12, %s674_s12  }
   0x4   : > { %s549_s18 = sadd.s32 1, %s499_s15   ;;  %s91_s19 = sadd.s32 1, %s495_s14 }
   0x5   : > { %s88_s20 = ssub.s32 %s499_s15, %s549_s18  ;;  %p101_p0 = scmp.ne.s32.totalorder %s495_s14, %s491_s13 }
   0x6   : > { %p89_p1 = scmp.eq.s32.totalorder %s88_s20, 0  ;;  %p102_p2 = scmp.eq.s32.totalorder %s545_s16, 1 }
   0x7   : > { %p107_p3 = scmp.ne.s32.totalorder %s491_s13, %s487_s12  ;;  %p108_p4 = scmp.eq.s32.totalorder %s335_s17, 1 }
   0x8   : > { %s560_s21 = scalar_select %p89_p1, %s495_s14, %s91_s19  }
   0x9   : > { %p562_p5 = por %p102_p2, %p101_p0  ;;  %p566_p6 = por %p108_p4, %p107_p3 }
   0xa   : > { %p338_p7 = scmp.ge.s32.totalorder %s499_s15, 1  ;;  %p139_p8 = scmp.lt.s32.totalorder %s499_s15, 3 }
   0xc   : > { %p140_p9 = pnand %p338_p7, %p139_p8 }
   0xd   : > { %p162_p10 = scmp.lt.s32.totalorder (!%p140_p9), %s545_s16, 1  ;;  %s159_s25 = sand.u32 (!%p140_p9), 1, %s491_s13  }
   0xe   : > { %143 = sbr.rel (%p140_p9) target bundleno = 260 (0x104), region = 32  ;;  %s339_s26 = sshll.u32 (!%p140_p9), %s159_s25, 3 }
   0xf   : > { %s343_s29 = sshll.u32 (!%p140_p9), %s545_s16, 7  ;;  %s161_s30 = scalar_lea.vmem (!%p140_p9), [#allocation2], %s339_s26 }
  0x10   : > { %s276_s4 = sshll.u32 (!%p140_p9), %s161_s30, 4  ;;  %s633_s7 = scalar_lea.hbm (!%p140_p9), %s671_s3, %s343_s29  ;;  %s277_s4 = int_to_ptr.vmem [resolvable:$true] %s276_s4 }
  0x11   : > { %s263_s8 = scalar_lea.sflag (!%p140_p9), [#allocation3], %s159_s25  ;;  %s439_s9 = scalar_lea.vmem (!%p140_p9), %s277_s4, 128 }
  0x12   : > { %p440_p11 = scmp.ne.s32.totalorder (!%p140_p9), %s277_s4, %s439_s9 }
  0x13   : > { %v182_v0 = vld [vmem:[%s669_s1 + $0x78] sm:$0xff]  ;;  %v501_v1 = vmov 0.0   ;;  %v181_v2 = vld [vmem:[%s669_s1 + $0x70] sm:$0xff]  ;;  %vm502_vm0 = vmmov 0   ;;  %v180_v3 = vld [vmem:[%s669_s1 + $0x68] sm:$0xff]  ;;  %s163_s28 = scalar_select %p162_p10, %s545_s16, 1 }
  0x14   : > { %363 = vmatprep.subr.mxu0 %v501_v1  ;;  %395 = vmatprep.mubr.msk.f32.mxu0 %vm502_vm0, %v501_v1  ;;  %v179_v4 = vld [vmem:[%s669_s1 + $0x60] sm:$0xff]  ;;  %v178_v5 = vld [vmem:[%s669_s1 + $0x58] sm:$0xff]  ;;  %v177_v6 = vld [vmem:[%s669_s1 + $0x50] sm:$0xff]  ;;  %vm260_vm1 = vcmask 130048   ;;  %p441_p12 = pnand %p440_p11, %p562_p5  ;;  %s503_s16 = smov [#allocation2]  }
  0x15   : > { %364 = vmatpush3.msra.mxu0 %v182_v0  ;;  %v176_v7 = vld [vmem:[%s669_s1 + $0x48] sm:$0xff]  ;;  %v175_v8 = vld [vmem:[%s669_s1 + $0x40] sm:$0xff]  ;;  %v174_v9 = vld [vmem:[%s669_s1 + $0x38] sm:$0xff]  ;;  %s340_s6 = sshll.u32 %s163_s28, 3  ;;  %s443_s10 = sshll.u32 %s503_s16, 4  ;;  %s444_s10 = int_to_ptr.vmem [resolvable:$false] %s443_s10 }
  0x16   : > { %365 = vmatprep.subr.mxu0 %v501_v1  ;;  %v173_v10 = vld [vmem:[%s669_s1 + $0x30] sm:$0xff]  ;;  %v172_v11 = vld [vmem:[%s669_s1 + $0x28] sm:$0xff]  ;;  %v171_v12 = vld [vmem:[%s669_s1 + $0x20] sm:$0xff]  ;;  %s165_s19 = scalar_lea.vmem %s668_s0, %s340_s6  ;;  %p442_p13 = pneg %p441_p12 }
  0x17   : > { %366 = vmatpush3.msra.mxu0 %v181_v2  ;;  %v170_v13 = vld [vmem:[%s669_s1 + $0x18] sm:$0xff]  ;;  %v169_v14 = vld [vmem:[%s669_s1 + $0x10] sm:$0xff]  ;;  %v168_v15 = vld [vmem:[%s669_s1 + $0x8] sm:$0xff]  ;;  %s445_s11 = scalar_lea.vmem %s444_s10, 256  ;;  %p446_p0 = scmp.lt.s32.totalorder %s277_s4, %s444_s10 }
  0x18   : > { %367 = vmatprep.subr.mxu0 %v501_v1  ;;  %v167_v16 = vld [vmem:[%s669_s1] sm:$0xff]  ;;  %p447_p1 = scmp.lt.s32.totalorder %s445_s11, %s439_s9 }
  0x19   : > { %368 = vmatpush3.msra.mxu0 %v180_v3  ;;  %v166_v17 = vld [vmem:[%s165_s19] sm:$0xff] }
  0x1a   : > { %369 = vmatprep.subr.mxu0 %v501_v1  ;;  %v341_v18 = vld [vmem:[%s670_s2] ss:$0 sm:$0xff]  ;;  %p448_p2 = por %p447_p1, %p446_p0 }
  0x1b   : > { %370 = vmatpush3.msra.mxu0 %v179_v4 }
  0x1c   : > { %371 = vmatprep.subr.mxu0 %v501_v1  ;;  %p449_p3 = pnand %p448_p2, %p442_p13 }
  0x1d   : > { %372 = vmatpush3.msra.mxu0 %v178_v5 }
  0x1e   : > { %373 = vmatprep.subr.mxu0 %v501_v1 }
  0x1f   : > { %374 = vmatpush3.msra.mxu0 %v177_v6 }
  0x20   : > { %375 = vmatprep.subr.mxu0 %v501_v1 }
  0x21   : > { %376 = vmatpush3.msra.mxu0 %v176_v7 }
  0x22   : > { %377 = vmatprep.subr.mxu0 %v501_v1 }
  0x23   : > { %378 = vmatpush3.msra.mxu0 %v175_v8 }
  0x24   : > { %379 = vmatprep.subr.mxu0 %v501_v1 }
  0x25   : > { %380 = vmatpush3.msra.mxu0 %v174_v9 }
  0x26   : > { %381 = vmatprep.subr.mxu0 %v501_v1 }
  0x27   : > { %382 = vmatpush3.msra.mxu0 %v173_v10 }
  0x28   : > { %383 = vmatprep.subr.mxu0 %v501_v1 }
  0x29   : > { %384 = vmatpush3.msra.mxu0 %v172_v11 }
  0x2a   : > { %385 = vmatprep.subr.mxu0 %v501_v1 }
  0x2b   : > { %386 = vmatpush3.msra.mxu0 %v171_v12 }
  0x2c   : > { %387 = vmatprep.subr.mxu0 %v501_v1 }
  0x2d   : > { %388 = vmatpush3.msra.mxu0 %v170_v13 }
  0x2e   : > { %389 = vmatprep.subr.mxu0 %v501_v1 }
  0x2f   : > { %390 = vmatpush3.msra.mxu0 %v169_v14 }
  0x30   : > { %391 = vmatprep.subr.mxu0 %v501_v1 }
  0x31   : > { %392 = vmatpush3.msra.mxu0 %v168_v15 }
  0x32   : > { %393 = vmatprep.subr.mxu0 %v501_v1 }
  0x33   : > { %394 = vmatpush3.msra.mxu0 %v167_v16 }
  0x34   : > { %396 = vmatmul.mubr.f32.vlgmr.msra.gmra.mxu0 %v166_v17 }
  0xf4   : > { %v256_v19 = vpop.f32.mrf.mxu0 }
  0xf5   : > { %v257_v20 = vadd.f32 %v341_v18, %v256_v19 }
  0xf6   : > { %v397_v21 = vpop.f32.mrf.mxu0 }
  0xf7   : > { %261 = vst.msk [vmem:[%s161_s30] sm:$0xff] %vm260_vm1, %v257_v20 }
  0xf8   : > { %452 = shalt.err (!%p449_p3)
}
  0xf9   : > { %s453_s17 = scalar_lea.hbm %s633_s7, 128  ;;  %s457_s24 = scalar_lea.hbm %s671_s3, 256 }
  0xfa   : > { %p454_p4 = scmp.ne.s32.totalorder %s633_s7, %s453_s17  ;;  %p458_p9 = scmp.lt.s32.totalorder %s633_s7, %s671_s3 }
  0xfb   : > { %p459_p10 = scmp.lt.s32.totalorder %s457_s24, %s453_s17 }
  0xfc   : > { %p455_p7 = pnand %p454_p4, %p562_p5 }
  0xfd   : > { %p460_p11 = por %p459_p10, %p458_p9 }
  0xfe   : > { %p456_p8 = pneg %p455_p7 }
 0x100   : > { %p461_p12 = pnand %p460_p11, %p456_p8 }
 0x102   : > { %464 = shalt.err (!%p461_p12)
}
 0x103   : > { %398 = dma.vmem_to_hbm [thread:$0]  (%p562_p5), %s277_s4, 128, %s633_s7, %s263_s8  }
 0x104 PF: > { %p404_p13 = scmp.ge.s32.totalorder %s499_s15, 2  ;;  %s288_s27 = sand.u32 1, %s487_s12  }
 0x105   : > { %s289_s28 = scalar_lea.sflag [#allocation3], %s288_s27 }
 0x106   : > { %p401_p0 = pnand %p404_p13, %p566_p6 }
 0x108   : > { %p402_p1 = pneg %p401_p0 }
 0x10a   : > { %482 = dma.done.wait (%p402_p1), %s289_s28, 128  }
 0x10b   : > { %484 = vsyncadd (%p402_p1), %s289_s28, 4294967168  ;;  %p13_p2 = scmp.ge.s32.totalorder %s549_s18, 4   ;;  %s674_s12 = smov %s491_s13 }
 0x10c   : > { %s675_s13 = smov %s495_s14  ;;  %s676_s14 = smov %s560_s21 }
 0x10d   : > { %s677_s15 = smov %s549_s18  ;;  %15 = sbr.rel (!%p13_p2) target bundleno = 3 (0x3), region = 67 }
 0x112   :  { %294 = vsyncpa [#allocation3], 1 }
 0x113   :  { %296 = vsyncpa [#allocation3 + $0x1], 1 }

</bundles_post_ra>
